<compile_context>
chip_gen: v5e
topology: v5e:2x2
jax: 0.10.0
libtpu: 0.0.40
codegen_flags: <defaults>
</compile_context>

<pallas_src>
import jax
import jax.numpy as jnp
import numpy as np
from jax import lax
from jax.experimental import pallas as pl
from jax.experimental.pallas import tpu as pltpu


def _compensated_loss_kernel(x_ref, eb_ref, tgt_ref, bshift_ref, w1_ref, w2_ref,
                             out_ref):
    """Per-row-tile fused kernel: shared-exp double cross-entropy + alpha blend."""
    x = x_ref[...].astype(jnp.float32)      # [TN, C]  logits (bf16/f32 in HBM)
    eb = eb_ref[...]                        # [1, C]   exp(bias - max(bias)) <= 1
    tgt = tgt_ref[...]                      # [TN, 1]  int32 targets
    bshift = bshift_ref[...]                # [TN, 1]  bias[target] - max(bias)
    w1 = w1_ref[...]                        # [TN, 1]  (1-alpha) * weight[target]
    w2 = w2_ref[...]                        # [TN, 1]  alpha     * weight[target]

    c = x.shape[1]
    # [1, C] class-id row; the compare broadcasts against the [TN, 1] targets,
    # so no [TN, C] int32 temp is ever materialized.
    cls_ids = lax.broadcasted_iota(jnp.int32, (1, c), 1)
    is_tgt = cls_ids == tgt                                     # [TN, C] mask

    # One shared exp pass (EUP) + one max (XLU) feeds BOTH log-sum-exps.
    m = jnp.max(x, axis=-1, keepdims=True)                      # [TN, 1]
    e = jnp.exp(x - m)                                          # [TN, C]
    s_raw = jnp.sum(e, axis=-1, keepdims=True)                  # [TN, 1]
    s_comp = jnp.sum(e * eb, axis=-1, keepdims=True)            # [TN, 1]

    # Single remaining one-hot gather: the target logit.
    x_t = jnp.sum(jnp.where(is_tgt, x, 0.0), axis=-1, keepdims=True)

    base = m - x_t                                              # [TN, 1]
    nll_raw = base + jnp.log(s_raw)                             # CE(x)
    nll_comp = base + jnp.log(s_comp) - bshift                  # CE(x + bias)
    out_ref[...] = w1 * nll_comp + w2 * nll_raw


def _round_up(v, m):
    return ((v + m - 1) // m) * m


def compensated_loss(x, target, epoch, epoch_max, prior, inf, weight=None):
    """x: [N, C] logits (f32 or bf16), target: [N] int -> per-sample loss [N] f32."""
    n, c = x.shape
    x_dtype = jnp.dtype(x.dtype)
    if weight is None:
        weight = jnp.ones((c,), dtype=jnp.float32)

    # ---- wrapper-side scalar / per-row precompute (all tiny [C] / [N] work) --
    bias = (prior + inf).astype(jnp.float32)            # [C] log-prior correction
    bias_max = jnp.max(bias)                            # keeps exp() overflow-safe
    eb_row = jnp.exp(bias - bias_max).reshape(1, c)     # resident [1, C] row
    alpha = (jnp.float32(epoch) / jnp.float32(epoch_max)) ** 2
    w_f32 = weight.astype(jnp.float32)

    # ---- row-tile sizing ----------------------------------------------------
    # q: sublane quantum for x's dtype (8 rows f32, 16 rows bf16).
    q = max(8, 32 // x_dtype.itemsize)
    c_lanes = _round_up(c, 128)                  # VMEM lane footprint of one row
    tile_budget = 4 * 1024 * 1024                # ~4 MiB of f32 rows per step
    budget_rows = tile_budget // (c_lanes * 4)
    deep_pipeline = budget_rows < 2 * q          # huge-C regime: DMA-latency bound
    tn = max(q, min(4096, budget_rows))
    tn = max(q, (tn // q) * q)
    if n > q:
        # Keep grid >= 2 so the "parallel" axis still shards both v7x TCs.
        tn = min(tn, _round_up((n + 1) // 2, q))
    tn = min(tn, _round_up(n, q))
    n_pad = _round_up(n, tn)
    grid = n_pad // tn

    # Pad rows only; padded rows (zero logits, target 0) give finite garbage
    # that is sliced off.  Zero padding stays valid for bf16/fp16 inputs.
    tgt = target.astype(jnp.int32)
    if n_pad != n:
        x = jnp.pad(x, ((0, n_pad - n), (0, 0)))
        tgt = jnp.pad(tgt, (0, n_pad - n))

    # Per-row columns (gathered from [C] vectors here, not in the kernel).
    w_t = w_f32[tgt]
    bshift_col = (bias[tgt] - bias_max).reshape(n_pad, 1)
    w1_col = ((1.0 - alpha) * w_t).reshape(n_pad, 1)
    w2_col = (alpha * w_t).reshape(n_pad, 1)
    tgt_col = tgt.reshape(n_pad, 1)

    x_spec_kwargs = {}
    if deep_pipeline:
        # Only for very large C (tile clamped near q): 3-deep pipeline hides
        # DMA issue latency on v5e; harmless headroom-wise elsewhere.
        x_spec_kwargs = dict(pipeline_mode=pl.Buffered(3))

    out = pl.pallas_call(
        _compensated_loss_kernel,
        out_shape=jax.ShapeDtypeStruct((n_pad, 1), jnp.float32),
        grid=(grid,),
        in_specs=[
            pl.BlockSpec((tn, c), lambda i: (i, 0), **x_spec_kwargs),  # x tiles
            pl.BlockSpec((1, c), lambda i: (0, 0)),    # exp(bias - max): resident
            pl.BlockSpec((tn, 1), lambda i: (i, 0)),   # target column
            pl.BlockSpec((tn, 1), lambda i: (i, 0)),   # bias[target] - max(bias)
            pl.BlockSpec((tn, 1), lambda i: (i, 0)),   # (1-alpha) * weight[target]
            pl.BlockSpec((tn, 1), lambda i: (i, 0)),   # alpha     * weight[target]
        ],
        out_specs=pl.BlockSpec((tn, 1), lambda i: (i, 0)),
        compiler_params=pltpu.CompilerParams(
            dimension_semantics=("parallel",),         # megacore shard row tiles
            vmem_limit_bytes=48 * 1024 * 1024,         # safe on v5e/v6e/v7x
        ),
    )(x, eb_row, tgt_col, bshift_col, w1_col, w2_col)
    return out.reshape(n_pad)[:n]


def _reference(x, target, epoch, epoch_max, prior, inf, weight=None):
    n, c = x.shape
    if weight is None:
        weight = jnp.ones((c,), dtype=jnp.float32)
    alpha = (epoch / epoch_max) ** 2

    def ce(logits):
        logp = jax.nn.log_softmax(logits, axis=-1)
        nll = -jnp.take_along_axis(logp, target[:, None], axis=-1)[:, 0]
        return weight[target] * nll

    loss1 = ce(x + prior + inf)
    loss2 = ce(x)
    return (1.0 - alpha) * loss1 + alpha * loss2


if __name__ == "__main__":
    key = jax.random.PRNGKey(0)
    k_x, k_t, k_x2, k_t2, k_w, k_x3, k_t3 = jax.random.split(key, 7)

    # --- Case 1: tiny shapes matching the module's typical unit test --------
    N, C = 8, 16
    x = jax.random.normal(k_x, (N, C), dtype=jnp.float32)
    target = jax.random.randint(k_t, (N,), 0, C, dtype=jnp.int32)

    train_cls_num_list = np.arange(1, C + 1, dtype=np.float64) * 10.0
    inf_label_distribution = np.ones((C,), dtype=np.float64)
    prior = jnp.asarray(np.log(train_cls_num_list / train_cls_num_list.sum()),
                        dtype=jnp.float32)
    inf = jnp.asarray(np.log(inf_label_distribution / inf_label_distribution.sum()),
                      dtype=jnp.float32)

    epoch, epoch_max = 3.0, 10.0
    loss = jax.block_until_ready(
        compensated_loss(x, target, epoch, epoch_max, prior, inf))
    ref = _reference(x, target, epoch, epoch_max, prior, inf)
    np.testing.assert_allclose(np.asarray(loss), np.asarray(ref),
                               rtol=1e-5, atol=1e-4)

    # --- Case 2: multi-tile grid (row padding, non-128 C, class weights) ----
    N2, C2 = 1000, 40
    x2 = jax.random.normal(k_x2, (N2, C2), dtype=jnp.float32)
    t2 = jax.random.randint(k_t2, (N2,), 0, C2, dtype=jnp.int32)
    w2 = jax.random.uniform(k_w, (C2,), minval=0.5, maxval=1.5,
                            dtype=jnp.float32)
    cls2 = np.linspace(10.0, 500.0, C2)
    ones2 = np.ones((C2,), dtype=np.float64)
    prior2 = jnp.asarray(np.log(cls2 / cls2.sum()), dtype=jnp.float32)
    inf2 = jnp.asarray(np.log(ones2 / ones2.sum()), dtype=jnp.float32)

    loss2 = jax.block_until_ready(
        compensated_loss(x2, t2, 7.0, 10.0, prior2, inf2, weight=w2))
    ref2 = _reference(x2, t2, 7.0, 10.0, prior2, inf2, weight=w2)
    np.testing.assert_allclose(np.asarray(loss2), np.asarray(ref2),
                               rtol=1e-5, atol=1e-4)

    # --- Case 3: bf16 logits (halved HBM traffic path), looser tolerance ----
    N3, C3 = 64, 128
    x3 = jax.random.normal(k_x3, (N3, C3), dtype=jnp.float32).astype(jnp.bfloat16)
    t3 = jax.random.randint(k_t3, (N3,), 0, C3, dtype=jnp.int32)
    cls3 = np.linspace(5.0, 800.0, C3)
    ones3 = np.ones((C3,), dtype=np.float64)
    prior3 = jnp.asarray(np.log(cls3 / cls3.sum()), dtype=jnp.float32)
    inf3 = jnp.asarray(np.log(ones3 / ones3.sum()), dtype=jnp.float32)

    loss3 = jax.block_until_ready(
        compensated_loss(x3, t3, 5.0, 10.0, prior3, inf3))
    ref3 = _reference(x3.astype(jnp.float32), t3, 5.0, 10.0, prior3, inf3)
    np.testing.assert_allclose(np.asarray(loss3), np.asarray(ref3),
                               rtol=1e-3, atol=1e-3)

    print("KERNEL_OK")
</pallas_src>

<mosaic_0001>
module attributes {stable_mosaic.version = 11 : i64} {
  func.func @_compensated_loss_kernel(%arg0: i32, %arg1: memref<8x16xf32, #tpu.memory_space<vmem>>, %arg2: memref<1x16xf32, #tpu.memory_space<vmem>>, %arg3: memref<8x1xi32, #tpu.memory_space<vmem>>, %arg4: memref<8x1xf32, #tpu.memory_space<vmem>>, %arg5: memref<8x1xf32, #tpu.memory_space<vmem>>, %arg6: memref<8x1xf32, #tpu.memory_space<vmem>>, %arg7: memref<8x1xf32, #tpu.memory_space<vmem>>) attributes {dimension_semantics = [#tpu.dimension_semantics<parallel>], iteration_bounds = array<i64: 1>, scalar_prefetch = 0 : i64, scratch_operands = 0 : i64, tpu.core_type = #tpu.core_type<tc>, window_params = [{transform_indices = @transform_0, window_bounds = array<i64: 8, 16>}, {pipeline_mode = #tpu.pipeline_mode<synchronous>, transform_indices = @transform_1, window_bounds = array<i64: 1, 16>}, {transform_indices = @transform_2, window_bounds = array<i64: 8, 1>}, {transform_indices = @transform_3, window_bounds = array<i64: 8, 1>}, {transform_indices = @transform_4, window_bounds = array<i64: 8, 1>}, {transform_indices = @transform_5, window_bounds = array<i64: 8, 1>}, {transform_indices = @transform_6, window_bounds = array<i64: 8, 1>}]} {
    %c0 = arith.constant 0 : index
    %c0_0 = arith.constant 0 : index
    %0 = vector.load %arg1[%c0, %c0_0] : memref<8x16xf32, #tpu.memory_space<vmem>>, vector<8x16xf32>
    %c0_1 = arith.constant 0 : index
    %c0_2 = arith.constant 0 : index
    %1 = vector.load %arg2[%c0_1, %c0_2] : memref<1x16xf32, #tpu.memory_space<vmem>>, vector<1x16xf32>
    %c0_3 = arith.constant 0 : index
    %c0_4 = arith.constant 0 : index
    %2 = vector.load %arg3[%c0_3, %c0_4] : memref<8x1xi32, #tpu.memory_space<vmem>>, vector<8x1xi32>
    %c0_5 = arith.constant 0 : index
    %c0_6 = arith.constant 0 : index
    %3 = vector.load %arg4[%c0_5, %c0_6] : memref<8x1xf32, #tpu.memory_space<vmem>>, vector<8x1xf32>
    %c0_7 = arith.constant 0 : index
    %c0_8 = arith.constant 0 : index
    %4 = vector.load %arg5[%c0_7, %c0_8] : memref<8x1xf32, #tpu.memory_space<vmem>>, vector<8x1xf32>
    %c0_9 = arith.constant 0 : index
    %c0_10 = arith.constant 0 : index
    %5 = vector.load %arg6[%c0_9, %c0_10] : memref<8x1xf32, #tpu.memory_space<vmem>>, vector<8x1xf32>
    %6 = tpu.iota {dimensions = array<i32: 1>} : vector<1x16xi32>
    %7 = vector.broadcast %6 : vector<1x16xi32> to vector<8x16xi32>
    %8 = vector.broadcast %2 : vector<8x1xi32> to vector<8x16xi32>
    %9 = arith.cmpi eq, %7, %8 : vector<8x16xi32>
    %cst = arith.constant dense<0xFF800000> : vector<8xf32>
    %10 = vector.multi_reduction <maximumf>, %0, %cst [1] : vector<8x16xf32> to vector<8xf32>
    %11 = vector.shape_cast %10 : vector<8xf32> to vector<8x1xf32>
    %12 = vector.broadcast %11 : vector<8x1xf32> to vector<8x16xf32>
    %13 = arith.subf %0, %12 : vector<8x16xf32>
    %14 = math.exp %13 : vector<8x16xf32>
    %cst_11 = arith.constant dense<0.000000e+00> : vector<8xf32>
    %15 = vector.multi_reduction <add>, %14, %cst_11 [1] : vector<8x16xf32> to vector<8xf32>
    %16 = vector.shape_cast %15 : vector<8xf32> to vector<8x1xf32>
    %17 = vector.broadcast %1 : vector<1x16xf32> to vector<8x16xf32>
    %18 = arith.mulf %14, %17 : vector<8x16xf32>
    %cst_12 = arith.constant dense<0.000000e+00> : vector<8xf32>
    %19 = vector.multi_reduction <add>, %18, %cst_12 [1] : vector<8x16xf32> to vector<8xf32>
    %20 = vector.shape_cast %19 : vector<8xf32> to vector<8x1xf32>
    %cst_13 = arith.constant 0.000000e+00 : f32
    %21 = vector.broadcast %cst_13 : f32 to vector<8x16xf32>
    %22 = arith.select %9, %0, %21 : vector<8x16xi1>, vector<8x16xf32>
    %cst_14 = arith.constant dense<0.000000e+00> : vector<8xf32>
    %23 = vector.multi_reduction <add>, %22, %cst_14 [1] : vector<8x16xf32> to vector<8xf32>
    %24 = vector.shape_cast %23 : vector<8xf32> to vector<8x1xf32>
    %25 = arith.subf %11, %24 : vector<8x1xf32>
    %26 = math.log %16 : vector<8x1xf32>
    %27 = arith.addf %25, %26 : vector<8x1xf32>
    %28 = math.log %20 : vector<8x1xf32>
    %29 = arith.addf %25, %28 : vector<8x1xf32>
    %30 = arith.subf %29, %3 : vector<8x1xf32>
    %31 = arith.mulf %4, %30 : vector<8x1xf32>
    %32 = arith.mulf %5, %27 : vector<8x1xf32>
    %33 = arith.addf %31, %32 : vector<8x1xf32>
    %c0_15 = arith.constant 0 : index
    %c0_16 = arith.constant 0 : index
    %34 = vector.load %arg7[%c0_15, %c0_16] : memref<8x1xf32, #tpu.memory_space<vmem>>, vector<8x1xf32>
    tpu.vector_store %arg7[%c0_15, %c0_16], %33 {strides = array<i32>} : memref<8x1xf32, #tpu.memory_space<vmem>>, vector<8x1xf32>,
    return
  }
  func.func @transform_0(%arg0: i32) -> (i32, i32) {
    %c0_i32 = arith.constant 0 : i32
    %c0_i32_0 = arith.constant 0 : i32
    return %arg0, %c0_i32 : i32, i32
  }
  func.func @transform_1(%arg0: i32) -> (i32, i32) {
    %c0_i32 = arith.constant 0 : i32
    %c0_i32_0 = arith.constant 0 : i32
    %c0_i32_1 = arith.constant 0 : i32
    return %c0_i32, %c0_i32_0 : i32, i32
  }
  func.func @transform_2(%arg0: i32) -> (i32, i32) {
    %c0_i32 = arith.constant 0 : i32
    %c0_i32_0 = arith.constant 0 : i32
    return %arg0, %c0_i32 : i32, i32
  }
  func.func @transform_3(%arg0: i32) -> (i32, i32) {
    %c0_i32 = arith.constant 0 : i32
    %c0_i32_0 = arith.constant 0 : i32
    return %arg0, %c0_i32 : i32, i32
  }
  func.func @transform_4(%arg0: i32) -> (i32, i32) {
    %c0_i32 = arith.constant 0 : i32
    %c0_i32_0 = arith.constant 0 : i32
    return %arg0, %c0_i32 : i32, i32
  }
  func.func @transform_5(%arg0: i32) -> (i32, i32) {
    %c0_i32 = arith.constant 0 : i32
    %c0_i32_0 = arith.constant 0 : i32
    return %arg0, %c0_i32 : i32, i32
  }
  func.func @transform_6(%arg0: i32) -> (i32, i32) {
    %c0_i32 = arith.constant 0 : i32
    %c0_i32_0 = arith.constant 0 : i32
    return %arg0, %c0_i32 : i32, i32
  }
}

</mosaic_0001>

<bundles_post_ra>
// kernel: tpu_custom_call.1
= control target key start
LH: loop header
LB: loop body
LE: loop exit
PB: predicated region body
PF: predicated region fallthrough
CT: control target
= control target key end

     0   :  { %vm35_vm0 = vcmask 130048   ;;  %v82_v1 = vmov 0   ;;  %v29_v10 = vlaneseq  ;;  %vm67_vm2 = vcmask 7168   ;;  %s143_s0 = inlined_call_operand.vmem [shape: f32[8,16], index: 0, kind: input, shape index: {}]   ;;  %s144_s1 = inlined_call_operand.vmem [shape: f32[1,16], index: 1, kind: input, shape index: {}]   ;;  %s145_s2 = inlined_call_operand.vmem [shape: s32[8,1], index: 2, kind: input, shape index: {}]   ;;  %s146_s3 = inlined_call_operand.vmem [shape: f32[8,1], index: 3, kind: input, shape index: {}]   ;;  %s147_s4 = inlined_call_operand.vmem [shape: f32[8,1], index: 4, kind: input, shape index: {}]   ;;  %s148_s5 = inlined_call_operand.vmem [shape: f32[8,1], index: 5, kind: input, shape index: {}]   ;;  %s149_s6 = inlined_call_operand.vmem [shape: f32[8,1], index: 6, kind: output, shape index: {}]  }
   0x1   :  { %v23_v0 = vld [vmem:[%s143_s0] sm:$0xff]  ;;  %74 = vset.pattern.permute.xlu0 %v82_v1 }
   0x2   :  { %v36_v2 = vsel %vm35_vm0, %v23_v0, -inf  ;;  %v25_v3 = vld [vmem:[%s145_s2] sm:$0xff]  ;;  %v30_v12 = vand.u32 127, %v29_v10 }
   0x3   :  { %37 = vmax.xlane.f32.xlu0 %v36_v2  ;;  %v75_v7 = vld [vmem:[%s144_s1] ss:$0 sm:$0xff] }
   0x4   :  { %v26_v24 = vld [vmem:[%s146_s3] sm:$0xff] }
   0x5   :  { %v27_v28 = vld [vmem:[%s147_s4] sm:$0xff] }
   0x6   :  { %v28_v29 = vld [vmem:[%s148_s5] sm:$0xff] }
  0x17   :  { %32 = vperm.xlu0 %74, %v25_v3  }
  0x76   :  { %v38_v4 = vpop.xlane.xlu0 %37 }
  0x77   :  { %v39_v5 = vsub.f32 %v23_v0, %v38_v4 }
  0x79   :  { %v40_v6 = vmul.f32 1.442695, %v39_v5 }
  0x7b   :  { %76 = vpow2.f32 %v40_v6 }
  0x81   :  { %v77_v8 = vpop.eup %76 }
  0x82   :  { %v48_v9 = vmul.f32 %v77_v8, %v75_v7  ;;  %v42_v15 = vsel %vm35_vm0, %v77_v8, 0.0 }
  0x84   :  { %v49_v11 = vsel %vm35_vm0, %v48_v9, 0.0 }
  0x85   :  { %50 = vadd.xlane.f32.xlu1 %v49_v11 }
  0x89   :  { %v33_v13 = vpop.permute.xlu0 %32 }
  0x8a   :  { %vm34_vm1 = vcmp.eq.s32.totalorder %v30_v12, %v33_v13 }
  0x8b   :  { %v52_v14 = vsel %vm34_vm1, %v23_v0, 0.0 }
  0x8c   :  { %v53_v16 = vsel %vm35_vm0, %v52_v14, 0.0 }
  0x8d   :  { %43 = vadd.xlane.f32.xlu1 %v42_v15  ;;  %54 = vadd.xlane.f32.xlu2 %v53_v16 }
  0xf8   :  { %v51_v17 = vpop.xlane.xlu1 %50 }
  0xf9   :  { %78 = vlog2.f32 %v51_v17 }
  0xff   :  { %v79_v18 = vpop.eup %78 }
 0x100   :  { %v61_v19 = vmul.f32 0.6931472, %v79_v18  ;;  %v44_v20 = vpop.xlane.xlu1 %43  ;;  %v55_v21 = vpop.xlane.xlu2 %54 }
 0x101   :  { %80 = vlog2.f32 %v44_v20  ;;  %v56_v22 = vsub.f32 %v38_v4, %v55_v21 }
 0x103   :  { %v62_v23 = vadd.f32 %v61_v19, %v56_v22 }
 0x105   :  { %v63_v27 = vsub.f32 %v62_v23, %v26_v24 }
 0x107   :  { %v81_v25 = vpop.eup %80  ;;  %v64_v31 = vmul.f32 %v63_v27, %v27_v28 }
 0x108   :  { %v58_v26 = vmul.f32 0.6931472, %v81_v25 }
 0x10a   :  { %v59_v30 = vadd.f32 %v58_v26, %v56_v22 }
 0x10c   :  { %v65_v32 = vmul.f32 %v59_v30, %v28_v29 }
 0x10e   :  { %v66_v33 = vadd.f32 %v65_v32, %v64_v31 }
 0x110   :  { %68 = vst.msk [vmem:[%s149_s6] sm:$0xff] %vm67_vm2, %v66_v33 }

</bundles_post_ra>
